<compile_context>
chip_gen: v7x
topology: tpu7x:2x2x1
jax: 0.10.0
libtpu: 0.0.40
codegen_flags: <defaults>
</compile_context>

<pallas_src>
import functools

import jax
import jax.numpy as jnp
from jax import lax
from jax.experimental import pallas as pl
from jax.experimental.pallas import tpu as pltpu

INF = 1000000.0


def _radial_prob_kernel(col_sq_ref, x_tile_ref, xt_ref, o_ref, *, inv_alpha,
                        exp_in_bf16):
    tm, n = o_ref.shape

    x_tile = x_tile_ref[...]                                          # (TM, D)

    # Fold the 2/alpha scale into the small (TM, D) MXU operand instead of a
    # full (TM, N) multiply after the matmul.
    gram = jnp.dot(x_tile * (2.0 * inv_alpha), xt_ref[...],
                   preferred_element_type=jnp.float32)                # (TM, N)

    row_sq = inv_alpha * jnp.sum(x_tile * x_tile, axis=-1, keepdims=True)  # (TM, 1)

    # logits = -||x_i - x_j||^2 / alpha   (col_sq already carries the 1/alpha)
    logits = gram - row_sq - col_sq_ref[...]                          # 2 (TM, N) passes

    # Diagonal -> -INF (PyTorch fills INF after the /alpha, then negates).
    # One constant iota-difference compared against the scalar row origin:
    # global row (base + i) == col j   <=>   j - i == base.
    diag_diff = (lax.broadcasted_iota(jnp.int32, (tm, n), 1)
                 - lax.broadcasted_iota(jnp.int32, (tm, n), 0))       # constant
    row_base = pl.program_id(0) * tm
    logits = jnp.where(diag_diff == row_base, jnp.float32(-INF), logits)

    # Numerically-stable softmax over the lane axis. The max subtraction is kept
    # (matches torch semantics; protects against full-row underflow).
    m = jnp.max(logits, axis=-1, keepdims=True)
    z = logits - m
    if exp_in_bf16:
        # v6e/v7x: bf16 EUP exp runs ~2x the f32 rate; row sum kept in f32.
        e = jnp.exp(z.astype(jnp.bfloat16))
        denom = jnp.sum(e, axis=-1, keepdims=True, dtype=jnp.float32)
    else:
        e = jnp.exp(z)
        denom = jnp.sum(e, axis=-1, keepdims=True)

    # Exact reciprocal on a (TM, 1) slice: negligible cost, rows sum to 1
    # within f32 rounding (perf-review correctness concern on approx=True).
    o_ref[...] = (e * pl.reciprocal(denom)).astype(o_ref.dtype)


def _supports_bf16_exp():
    # v6e / v7x EUP has a bf16 transcendental path; v5e and older do not.
    try:
        kind = jax.devices()[0].device_kind.lower()
    except Exception:
        return False
    return ("v6" in kind) or ("v7" in kind)


def _vmem_limit_bytes():
    # Generation-aware budget: 128 MiB parts (v5e/v6e) vs 64 MiB per TC (v7x).
    try:
        cap = int(pltpu.get_tpu_info().vmem_capacity_bytes)
    except Exception:
        cap = 64 * 1024 * 1024
    if cap >= 128 * 1024 * 1024:
        return 100 * 1024 * 1024
    return 40 * 1024 * 1024


def _choose_tm(n_pad, d, vmem_limit):
    # Resident inputs (x^T, col_sq) counted conservatively as if double-buffered,
    # plus slack for Mosaic internal scratch.
    resident = 2 * 4 * n_pad * (d + 1)
    budget = max(vmem_limit - resident - (4 << 20), 2 << 20)
    # ~7 live (TM, N_pad) f32 buffers: 2x output double-buffer, gram, the logits
    # chain, the select temp, e (+ headroom).
    cap = budget // (7 * n_pad * 4)
    # Keep >= 2 grid steps so the "parallel" row axis can split across both
    # TensorCores on v7x.
    cap = min(cap, n_pad // 2)
    cap = max(cap, 8)
    for cand in (1024, 512, 256, 128, 64, 32, 16, 8):
        if cand <= cap and n_pad % cand == 0:
            return cand
    return 8  # n_pad is a multiple of 128, so 8 always divides


def radial_probability(x, alpha, *, tm=None, out_dtype=jnp.float32,
                       exp_in_bf16=None):
    """Pallas equivalent of RadialProbability(alpha)(x) for 2-D x of shape (N, D)."""
    x = jnp.asarray(x, jnp.float32)
    n, d = x.shape
    inv_alpha = 1.0 / float(alpha)
    if exp_in_bf16 is None:
        exp_in_bf16 = _supports_bf16_exp()

    # Pad the point count to a multiple of 128: lane-dense unmasked stores on the
    # (TM, N_pad) output and a robust tile selection for awkward N.
    n_pad = ((n + 127) // 128) * 128
    x_pad = x if n_pad == n else jnp.pad(x, ((0, n_pad - n), (0, 0)))

    # Column norms hoisted out of the per-tile body, pre-scaled by 1/alpha and
    # delivered lane-major. Padded columns get a huge bias so their logits sit at
    # ~-2e6 and exp() underflows to exactly 0 -> no in-kernel column mask pass.
    col_sq = jnp.sum(x_pad * x_pad, axis=-1) * inv_alpha
    if n_pad != n:
        col_sq = jnp.where(jnp.arange(n_pad) < n, col_sq, jnp.float32(2.0 * INF))
    col_sq = col_sq[None, :].astype(jnp.float32)                      # (1, N_pad)

    # One-off transpose in the wrapper -> plain A @ B on the MXU in the kernel
    # (no hidden per-grid-step relayout of the resident (N, D) operand).
    xt = x_pad.T                                                      # (D, N_pad)

    vmem_limit = _vmem_limit_bytes()
    if tm is None:
        tm = _choose_tm(n_pad, d, vmem_limit)
    assert n_pad % tm == 0, f"row tile {tm} must divide padded N={n_pad}"

    kernel = functools.partial(_radial_prob_kernel, inv_alpha=inv_alpha,
                               exp_in_bf16=bool(exp_in_bf16))

    cost = pl.CostEstimate(
        flops=2 * n_pad * n_pad * d + 7 * n_pad * n_pad,
        transcendentals=n_pad * n_pad,
        bytes_accessed=4 * (2 * n_pad * d + n_pad)
        + n_pad * n_pad * jnp.dtype(out_dtype).itemsize,
    )

    out = pl.pallas_call(
        kernel,
        out_shape=jax.ShapeDtypeStruct((n_pad, n_pad), out_dtype),
        grid=(n_pad // tm,),
        in_specs=[
            # Constant-index (resident) inputs: single-buffered to save VMEM.
            pl.BlockSpec((1, n_pad), lambda i: (0, 0),
                         pipeline_mode=pl.Buffered(1)),               # col_sq
            pl.BlockSpec((tm, d), lambda i: (i, 0)),                  # row tile of x
            pl.BlockSpec((d, n_pad), lambda i: (0, 0),
                         pipeline_mode=pl.Buffered(1)),               # x^T, resident
        ],
        out_specs=pl.BlockSpec((tm, n_pad), lambda i: (i, 0)),
        compiler_params=pltpu.CompilerParams(
            dimension_semantics=("parallel",),  # rows independent -> 2 TCs on v7x
            vmem_limit_bytes=vmem_limit,
        ),
        cost_estimate=cost,
    )(col_sq, x_pad, xt)

    if n_pad != n:
        out = out[:n, :n]
    return out


def _reference(x, alpha):
    # Pure-JAX reference mirroring the PyTorch module exactly.
    delta = x[:, None, :] - x[None, :, :]
    dist = jnp.sum(delta * delta, axis=-1) / alpha
    n = dist.shape[0]
    dist = jnp.where(jnp.eye(n, dtype=bool), INF, dist)
    return jax.nn.softmax(-dist, axis=-1)


if __name__ == "__main__":
    key = jax.random.PRNGKey(0)
    alpha = 2.0  # the module's only __init__ argument (no learned weights)
    k1, k2, k3 = jax.random.split(key, 3)

    # TODO(synk): the module's optional precomputed-`distance` forward argument
    # is not implemented; the kernel always computes distances from x.

    # Small (N, D) point cloud; f32 exp -> tight tolerance. N=16 pads to 128,
    # tm=32 -> 4 grid steps, exercising the offset diagonal mask and padding.
    x1 = jax.random.normal(k1, (16, 8), dtype=jnp.float32)
    out1 = jax.block_until_ready(
        radial_probability(x1, alpha, tm=32, exp_in_bf16=False))
    ref1 = _reference(x1, alpha)
    assert out1.shape == (16, 16) and out1.dtype == jnp.float32
    assert jnp.allclose(out1, ref1, atol=1e-4, rtol=1e-4), "mismatch (N=16)"

    # Lane-aligned N, multi-step pipelined grid, f32 exp.
    x2 = jax.random.normal(k2, (128, 32), dtype=jnp.float32)
    out2 = jax.block_until_ready(
        radial_probability(x2, alpha, tm=64, exp_in_bf16=False))
    ref2 = _reference(x2, alpha)
    assert jnp.allclose(out2, ref2, atol=1e-4, rtol=1e-4), "mismatch (N=128)"

    # Ragged N (padding path) with auto tile size and auto exp precision
    # (bf16 on v6e/v7x) -> looser tolerance.
    x3 = jax.random.normal(k3, (200, 16), dtype=jnp.float32)
    out3 = jax.block_until_ready(radial_probability(x3, alpha))
    ref3 = _reference(x3, alpha)
    assert out3.shape == (200, 200)
    assert jnp.allclose(out3, ref3, atol=3e-2, rtol=3e-2), "mismatch (N=200)"

    print("KERNEL_OK")
</pallas_src>

<mosaic_0001>
module attributes {stable_mosaic.version = 11 : i64} {
  func.func @_radial_prob_kernel(%arg0: i32, %arg1: memref<1x128xf32, #tpu.memory_space<vmem>>, %arg2: memref<32x8xf32, #tpu.memory_space<vmem>>, %arg3: memref<8x128xf32, #tpu.memory_space<vmem>>, %arg4: memref<32x128xf32, #tpu.memory_space<vmem>>) attributes {dimension_semantics = [#tpu.dimension_semantics<parallel>], iteration_bounds = array<i64: 4>, scalar_prefetch = 0 : i64, scratch_operands = 0 : i64, tpu.core_type = #tpu.core_type<tc>, window_params = [{pipeline_mode = #tpu.pipeline_mode<synchronous>, transform_indices = @transform_0, window_bounds = array<i64: 1, 128>}, {transform_indices = @transform_1, window_bounds = array<i64: 32, 8>}, {pipeline_mode = #tpu.pipeline_mode<synchronous>, transform_indices = @transform_2, window_bounds = array<i64: 8, 128>}, {transform_indices = @transform_3, window_bounds = array<i64: 32, 128>}]} {
    %c0 = arith.constant 0 : index
    %c0_0 = arith.constant 0 : index
    %0 = vector.load %arg2[%c0, %c0_0] : memref<32x8xf32, #tpu.memory_space<vmem>>, vector<32x8xf32>
    %cst = arith.constant 1.000000e+00 : f32
    %1 = vector.broadcast %cst : f32 to vector<32x8xf32>
    %2 = arith.mulf %0, %1 : vector<32x8xf32>
    %c0_1 = arith.constant 0 : index
    %c0_2 = arith.constant 0 : index
    %3 = vector.load %arg3[%c0_1, %c0_2] : memref<8x128xf32, #tpu.memory_space<vmem>>, vector<8x128xf32>
    %cst_3 = arith.constant dense<0.000000e+00> : vector<32x128xf32>
    %4 = tpu.matmul %2, %3, %cst_3 {dimension_numbers = #tpu.dot_dimension_numbers<[1], [0], [0], [1], [0, 0, 1, 1], [], []>} : vector<32x8xf32>, vector<8x128xf32>, vector<32x128xf32> -> vector<32x128xf32>
    %5 = arith.mulf %0, %0 : vector<32x8xf32>
    %cst_4 = arith.constant dense<0.000000e+00> : vector<32xf32>
    %6 = vector.multi_reduction <add>, %5, %cst_4 [1] : vector<32x8xf32> to vector<32xf32>
    %7 = vector.shape_cast %6 : vector<32xf32> to vector<32x1xf32>
    %cst_5 = arith.constant 5.000000e-01 : f32
    %8 = vector.broadcast %cst_5 : f32 to vector<32x1xf32>
    %9 = arith.mulf %8, %7 : vector<32x1xf32>
    %10 = vector.broadcast %9 : vector<32x1xf32> to vector<32x128xf32>
    %11 = arith.subf %4, %10 : vector<32x128xf32>
    %c0_6 = arith.constant 0 : index
    %c0_7 = arith.constant 0 : index
    %12 = vector.load %arg1[%c0_6, %c0_7] : memref<1x128xf32, #tpu.memory_space<vmem>>, vector<1x128xf32>
    %13 = vector.broadcast %12 : vector<1x128xf32> to vector<32x128xf32>
    %14 = arith.subf %11, %13 : vector<32x128xf32>
    %15 = tpu.iota {dimensions = array<i32: 1>} : vector<32x128xi32>
    %16 = tpu.iota {dimensions = array<i32: 0>} : vector<32x128xi32>
    %17 = arith.subi %15, %16 : vector<32x128xi32>
    %c32_i32 = arith.constant 32 : i32
    %18 = arith.muli %arg0, %c32_i32 : i32
    %19 = vector.broadcast %18 : i32 to vector<32x128xi32>
    %20 = arith.cmpi eq, %17, %19 : vector<32x128xi32>
    %cst_8 = arith.constant -1.000000e+06 : f32
    %21 = vector.broadcast %cst_8 : f32 to vector<32x128xf32>
    %22 = arith.select %20, %21, %14 : vector<32x128xi1>, vector<32x128xf32>
    %cst_9 = arith.constant dense<0xFF800000> : vector<32xf32>
    %23 = vector.multi_reduction <maximumf>, %22, %cst_9 [1] : vector<32x128xf32> to vector<32xf32>
    %24 = vector.shape_cast %23 : vector<32xf32> to vector<32x1xf32>
    %25 = vector.broadcast %24 : vector<32x1xf32> to vector<32x128xf32>
    %26 = arith.subf %22, %25 : vector<32x128xf32>
    %27 = math.exp %26 : vector<32x128xf32>
    %cst_10 = arith.constant dense<0.000000e+00> : vector<32xf32>
    %28 = vector.multi_reduction <add>, %27, %cst_10 [1] : vector<32x128xf32> to vector<32xf32>
    %29 = vector.shape_cast %28 : vector<32xf32> to vector<32x1xf32>
    %30 = tpu.reciprocal %29 : vector<32x1xf32> -> vector<32x1xf32>
    %31 = vector.broadcast %30 : vector<32x1xf32> to vector<32x128xf32>
    %32 = arith.mulf %27, %31 : vector<32x128xf32>
    %c0_11 = arith.constant 0 : index
    %c0_12 = arith.constant 0 : index
    %33 = vector.load %arg4[%c0_11, %c0_12] : memref<32x128xf32, #tpu.memory_space<vmem>>, vector<32x128xf32>
    tpu.vector_store %arg4[%c0_11, %c0_12], %32 {strides = array<i32>} : memref<32x128xf32, #tpu.memory_space<vmem>>, vector<32x128xf32>,
    return
  }
  func.func @transform_0(%arg0: i32) -> (i32, i32) {
    %c0_i32 = arith.constant 0 : i32
    %c0_i32_0 = arith.constant 0 : i32
    %c0_i32_1 = arith.constant 0 : i32
    return %c0_i32, %c0_i32_0 : i32, i32
  }
  func.func @transform_1(%arg0: i32) -> (i32, i32) {
    %c0_i32 = arith.constant 0 : i32
    %c0_i32_0 = arith.constant 0 : i32
    return %arg0, %c0_i32 : i32, i32
  }
  func.func @transform_2(%arg0: i32) -> (i32, i32) {
    %c0_i32 = arith.constant 0 : i32
    %c0_i32_0 = arith.constant 0 : i32
    %c0_i32_1 = arith.constant 0 : i32
    return %c0_i32, %c0_i32_0 : i32, i32
  }
  func.func @transform_3(%arg0: i32) -> (i32, i32) {
    %c0_i32 = arith.constant 0 : i32
    %c0_i32_0 = arith.constant 0 : i32
    return %arg0, %c0_i32 : i32, i32
  }
}

</mosaic_0001>

<bundles_post_ra>
// kernel: tpu_custom_call.1
= control target key start
LH: loop header
LB: loop body
LE: loop exit
PB: predicated region body
PF: predicated region fallthrough
CT: control target
= control target key end

     0   :  { %8 = vsyncpa [#allocation3], 0  ;;  %s742_s0 = inlined_call_operand.vmem [shape: f32[1,128], index: 0, kind: input, shape index: {}]   ;;  %s743_s1 = inlined_call_operand.vmem [shape: f32[128,8], index: 1, kind: input, shape index: {}]   ;;  %s744_s2 = inlined_call_operand.vmem [shape: f32[8,128], index: 2, kind: input, shape index: {}]   ;;  %s745_s3 = inlined_call_operand.hbm [shape: f32[128,128], index: 3, kind: output, shape index: {}]  }
   0x1   :  { %10 = vsyncpa [#allocation3 + $0x1], 0  ;;  %s625_s12 = smov 0   ;;  %s627_s13 = smov 0  }
   0x2   :  { %s629_s14 = smov 0   ;;  %s631_s15 = smov 0  }
   0x3 LB: > { %s646_s16 = sadd.s32 4294967295, %s600_s15   ;;  %s447_s17 = sadd.s32 4294967294, %s600_s15   ;;  %s600_s15 = sphi %s631_s15, %s751_s15   ;;  %s596_s14 = sphi %s629_s14, %s750_s14   ;;  %s592_s13 = sphi %s627_s13, %s749_s13   ;;  %s588_s12 = sphi %s625_s12, %s748_s12  }
   0x4   : > { %s650_s18 = sadd.s32 1, %s600_s15   ;;  %s91_s19 = sadd.s32 1, %s596_s14 }
   0x5   : > { %s88_s20 = ssub.s32 %s600_s15, %s650_s18  ;;  %p101_p0 = scmp.ne.s32.totalorder %s596_s14, %s592_s13 }
   0x6   : > { %p89_p1 = scmp.eq.s32.totalorder %s88_s20, 0  ;;  %p102_p2 = scmp.eq.s32.totalorder %s646_s16, 3 }
   0x7   : > { %p107_p3 = scmp.ne.s32.totalorder %s592_s13, %s588_s12  ;;  %p108_p4 = scmp.eq.s32.totalorder %s447_s17, 3 }
   0x8   : > { %s661_s21 = scalar_select %p89_p1, %s596_s14, %s91_s19  }
   0x9   : > { %p663_p5 = por %p102_p2, %p101_p0  ;;  %p667_p6 = por %p108_p4, %p107_p3 }
   0xa   : > { %p450_p7 = scmp.ge.s32.totalorder %s600_s15, 1  ;;  %p141_p8 = scmp.lt.s32.totalorder %s600_s15, 5 }
   0xc   : > { %p142_p9 = pnand %p450_p7, %p141_p8 }
   0xd   : > { %v176_v0 = vld [vmem:[%s744_s2] sm:$0xff] (!%p142_p9)  ;;  %s452_s26 = sshll.u32 (!%p142_p9), %s646_s16, 2  ;;  %vm177_vm0 = vcmask (!%p142_p9), 64512   ;;  %v310_v13 = vlaneseq (!%p142_p9)  ;;  %s459_s4 = sshll.u32 (!%p142_p9), %s646_s16, 5 }
   0xe   : > { %145 = sbr.rel (%p142_p9) target bundleno = 575 (0x23f), region = 32  ;;  %471 = vmatprep.subr.mxu0 (!%p142_p9), %v176_v0  ;;  %479 = vmatprep.subr.mxu1 (!%p142_p9), %v176_v0  ;;  %p166_p10 = scmp.lt.s32.totalorder (!%p142_p9), %s452_s26, 15  ;;  %v322_v26 = vstv (!%p142_p9), %s459_s4  ;;  %v458_v32 = vld [vmem:[%s742_s0] ss:$0 sm:$0xff] (!%p142_p9) }
   0xf   : > { %472 = vmatpush3.msra.mxu0 (!%p142_p9), %v176_v0  ;;  %480 = vmatpush3.msra.mxu1 (!%p142_p9), %v176_v0  ;;  %v313_v16 = vshrl.u32 (!%p142_p9), %v310_v13, 7  ;;  %v311_v19 = vand.u32 (!%p142_p9), 127, %v310_v13  ;;  %s162_s7 = sand.u32 (!%p142_p9), 1, %s592_s13   ;;  %s465_s9 = sshll.u32 (!%p142_p9), %s646_s16, 9 }
  0x10   : > { %s451_s8 = sshll.u32 (!%p142_p9), %s162_s7, 5  ;;  %s697_s20 = scalar_lea.hbm (!%p142_p9), %s745_s3, %s465_s9 }
  0x11   : > { %v314_v20 = vadd.s32 (!%p142_p9), 8, %v313_v16  ;;  %v316_v21 = vadd.s32 (!%p142_p9), 24, %v313_v16  ;;  %v317_v27 = vsub.s32 (!%p142_p9), %v311_v19, %v313_v16  ;;  %v315_v28 = vadd.s32 (!%p142_p9), 16, %v313_v16  ;;  %s164_s10 = scalar_lea.vmem (!%p142_p9), [#allocation2], %s451_s8  ;;  %s701_s16 = scalar_lea.sflag (!%p142_p9), [#allocation3], %s162_s7 }
  0x12   : > { %s385_s11 = sshll.u32 (!%p142_p9), %s164_s10, 4  ;;  %s602_s25 = smov (!%p142_p9), [#allocation2]   ;;  %s699_s11 = int_to_ptr.vmem [resolvable:$true] %s385_s11 }
  0x13   : > { %v318_v25 = vsub.s32 (!%p142_p9), %v311_v19, %v314_v20  ;;  %v320_v33 = vsub.s32 (!%p142_p9), %v311_v19, %v316_v21  ;;  %vm323_vm2 = vcmp.eq.s32.totalorder (!%p142_p9), %v317_v27, %v322_v26  ;;  %v319_v42 = vsub.s32 (!%p142_p9), %v311_v19, %v315_v28  ;;  %s538_s24 = scalar_lea.vmem (!%p142_p9), %s699_s11, 512 }
  0x14   : > { %p539_p11 = scmp.ne.s32.totalorder (!%p142_p9), %s699_s11, %s538_s24 }
  0x15   : > { %s753_s26 = smov (!%p166_p10, %s452_s26), 15  ;;  %vm324_vm1 = vcmp.eq.s32.totalorder %v318_v25, %v322_v26  ;;  %vm326_vm3 = vcmp.eq.s32.totalorder %v320_v33, %v322_v26  ;;  %vm325_vm4 = vcmp.eq.s32.totalorder %v319_v42, %v322_v26 }
  0x16   : > { %s453_s27 = sshll.u32 %s753_s26, 3  ;;  %p540_p12 = pnand %p539_p11, %p663_p5 }
  0x17   : > { %s169_s30 = scalar_lea.vmem %s743_s1, %s453_s27  ;;  %s542_s26 = sshll.u32 %s602_s25, 4  ;;  %s543_s26 = int_to_ptr.vmem [resolvable:$false] %s542_s26 }
  0x18   : > { %v172_v1 = vld [vmem:[%s169_s30] sm:$0xff]  ;;  %v174_v2 = vld [vmem:[%s169_s30 + $0x10] sm:$0xff]  ;;  %v173_v3 = vld [vmem:[%s169_s30 + $0x8] sm:$0xff]  ;;  %p541_p13 = pneg %p540_p12  ;;  %s544_s27 = scalar_lea.vmem %s543_s26, 1024 }
  0x19   : > { %473 = vmatprep.mubr.msk.f32.mxu0 %vm177_vm0, %v172_v1  ;;  %v275_v4 = vmul.f32 %v172_v1, %v172_v1  ;;  %476 = vmatprep.mubr.msk.f32.mxu1 %vm177_vm0, %v174_v2  ;;  %v277_v5 = vmul.f32 %v174_v2, %v174_v2  ;;  %v175_v6 = vld [vmem:[%s169_s30 + $0x18] sm:$0xff]  ;;  %v276_v7 = vmul.f32 %v173_v3, %v173_v3  ;;  %p545_p0 = scmp.lt.s32.totalorder %s699_s11, %s543_s26  ;;  %p546_p1 = scmp.lt.s32.totalorder %s544_s27, %s538_s24 }
  0x1a   : > { %474 = vmatmul.mubr.msk.f32.vlgmr.msra.gmra.mrb[0].mxu0 %vm177_vm0, %v173_v3  ;;  %477 = vmatmul.mubr.msk.f32.vlgmr.msra.gmra.mrb[0].mxu1 %vm177_vm0, %v175_v6  ;;  %v278_v8 = vmul.f32 %v175_v6, %v175_v6 }
  0x1b   : > { %v279_v9 = vsel %vm177_vm0, %v275_v4, 0.0  ;;  %v285_v10 = vsel %vm177_vm0, %v277_v5, 0.0  ;;  %v282_v11 = vsel %vm177_vm0, %v276_v7, 0.0  ;;  %p547_p2 = por %p546_p1, %p545_p0 }
  0x1c   : > { %280 = vadd.xlane.f32.xlu0 %v279_v9  ;;  %286 = vadd.xlane.f32.xlu1 %v285_v10  ;;  %v288_v12 = vsel %vm177_vm0, %v278_v8, 0.0 }
  0x1d   : > { %p548_p3 = pnand %p547_p2, %p541_p13 }
  0x20   : > { %283 = vadd.xlane.f32.xlu0 %v282_v11  ;;  %289 = vadd.xlane.f32.xlu1 %v288_v12 }
  0xa9   : > { %v281_v14 = vpop.xlane.xlu0 %280  ;;  %v287_v15 = vpop.xlane.xlu1 %286 }
  0xaa   : > { %v293_v24 = vmul.f32 0.5, %v287_v15  ;;  %v291_v29 = vmul.f32 0.5, %v281_v14 }
  0xad   : > { %v284_v17 = vpop.xlane.xlu0 %283  ;;  %v290_v18 = vpop.xlane.xlu1 %289 }
  0xae   : > { %v292_v22 = vmul.f32 0.5, %v284_v17  ;;  %v294_v23 = vmul.f32 0.5, %v290_v18 }
  0xed   : > { %v475_v30 = vpop.f32.mrb[0].mxu0  ;;  %v478_v31 = vpop.f32.mrb[0].mxu1 }
  0xee   : > { %v296_v34 = vsub.f32 %v475_v30, %v292_v22  ;;  %v256_v35 = vpop.f32.mrb[1].mxu0  ;;  %v266_v36 = vpop.f32.mrb[1].mxu1  ;;  %v298_v37 = vsub.f32 %v478_v31, %v294_v23 }
  0xef   : > { %v295_v38 = vsub.f32 %v256_v35, %v291_v29  ;;  %v297_v39 = vsub.f32 %v266_v36, %v293_v24 }
  0xf0   : > { %v307_v40 = vsub.f32 %v296_v34, %v458_v32  ;;  %v309_v41 = vsub.f32 %v298_v37, %v458_v32 }
  0xf1   : > { %v306_v43 = vsub.f32 %v295_v38, %v458_v32  ;;  %v308_v46 = vsub.f32 %v297_v39, %v458_v32 }
  0xf2   : > { %v328_v44 = vsel %vm324_vm1, -1000000.0, %v307_v40  ;;  %v330_v47 = vsel %vm326_vm3, -1000000.0, %v309_v41 }
  0xf3   : > { %333 = vmax.xlane.f32.xlu1 %v328_v44  ;;  %v327_v45 = vsel %vm323_vm2, -1000000.0, %v306_v43  ;;  %v329_v48 = vsel %vm325_vm4, -1000000.0, %v308_v46 }
  0xf4   : > { %331 = vmax.xlane.f32.xlu0 %v327_v45 }
  0xf7   : > { %337 = vmax.xlane.f32.xlu1 %v330_v47 }
  0xf8   : > { %335 = vmax.xlane.f32.xlu0 %v329_v48 }
 0x180   : > { %v334_v49 = vpop.xlane.xlu1 %333 }
 0x181   : > { %v340_v50 = vsub.f32 %v328_v44, %v334_v49  ;;  %v332_v51 = vpop.xlane.xlu0 %331 }
 0x182   : > { %v339_v52 = vsub.f32 %v327_v45, %v332_v51 }
 0x183   : > { %v345_v53 = vmul.f32 1.442695, %v340_v50 }
 0x184   : > { %v343_v54 = vmul.f32 1.442695, %v339_v52  ;;  %v338_v55 = vpop.xlane.xlu1 %337 }
 0x185   : > { %522 = vpow2.f32 %v345_v53  ;;  %v342_v56 = vsub.f32 %v330_v47, %v338_v55  ;;  %v336_v57 = vpop.xlane.xlu0 %335 }
 0x186   : > { %524 = vpow2.f32 %v343_v54  ;;  %v341_v58 = vsub.f32 %v329_v48, %v336_v57 }
 0x187   : > { %v349_v59 = vmul.f32 1.442695, %v342_v56 }
 0x188   : > { %v347_v60 = vmul.f32 1.442695, %v341_v58 }
 0x189   : > { %526 = vpow2.f32 %v349_v59 }
 0x18a   : > { %528 = vpow2.f32 %v347_v60 }
 0x18f   : > { %v523_v61 = vpop.eup %522 }
 0x190   : > { %v525_v62 = vpop.eup %524  ;;  %353 = vadd.xlane.f32.xlu1 %v523_v61 }
 0x191   : > { %351 = vadd.xlane.f32.xlu0 %v525_v62 }
 0x193   : > { %v527_v63 = vpop.eup %526 }
 0x194   : > { %v529_v0 = vpop.eup %528  ;;  %357 = vadd.xlane.f32.xlu1 %v527_v63 }
 0x195   : > { %355 = vadd.xlane.f32.xlu0 %v529_v0 }
 0x21d   : > { %v354_v1 = vpop.xlane.xlu1 %353 }
 0x21e   : > { %530 = vrcp.f32 %v354_v1  ;;  %v352_v2 = vpop.xlane.xlu0 %351 }
 0x21f   : > { %532 = vrcp.f32 %v352_v2 }
 0x221   : > { %v358_v3 = vpop.xlane.xlu1 %357 }
 0x222   : > { %534 = vrcp.f32 %v358_v3  ;;  %v356_v4 = vpop.xlane.xlu0 %355 }
 0x223   : > { %536 = vrcp.f32 %v356_v4 }
 0x228   : > { %v531_v5 = vpop.eup %530 }
 0x229   : > { %v533_v6 = vpop.eup %532  ;;  %v364_v7 = vmul.f32 %v531_v5, %v523_v61 }
 0x22a   : > { %v363_v8 = vmul.f32 %v533_v6, %v525_v62 }
 0x22b   : > { %368 = vst [vmem:[%s164_s10 + $0x8] sm:$0xff] %v364_v7 }
 0x22c   : > { %v535_v9 = vpop.eup %534  ;;  %367 = vst [vmem:[%s164_s10] sm:$0xff] %v363_v8 }
 0x22d   : > { %v537_v10 = vpop.eup %536  ;;  %v366_v11 = vmul.f32 %v535_v9, %v527_v63 }
 0x22e   : > { %v365_v12 = vmul.f32 %v537_v10, %v529_v0 }
 0x22f   : > { %370 = vst [vmem:[%s164_s10 + $0x18] sm:$0xff] %v366_v11 }
 0x230   : > { %369 = vst [vmem:[%s164_s10 + $0x10] sm:$0xff] %v365_v12 }
 0x231   : > { %551 = shalt.err (!%p548_p3)
}
 0x232   : > { %s552_s28 = scalar_lea.hbm %s697_s20, 512  ;;  %s556_s4 = scalar_lea.hbm %s745_s3, 2048 }
 0x233   : > { %p553_p4 = scmp.ne.s32.totalorder %s697_s20, %s552_s28  ;;  %p557_p9 = scmp.lt.u32.totalorder %s697_s20, %s745_s3 }
 0x234   : > { %p558_p10 = scmp.lt.u32.totalorder %s556_s4, %s552_s28  ;;  %p560_p12 = scmp.lt.u32.totalorder %s552_s28, %s697_s20 }
 0x235   : > { %p554_p7 = pnand %p553_p4, %p663_p5 }
 0x236   : > { %p559_p11 = por %p558_p10, %p557_p9 }
 0x237   : > { %p555_p8 = pneg %p554_p7 }
 0x238   : > { %p561_p13 = por %p560_p12, %p559_p11 }
 0x23a   : > { %p562_p0 = pnand %p561_p13, %p555_p8 }
 0x23c   : > { %565 = shalt.err (!%p562_p0)
}
 0x23d   : > { %s603_s7 = smov 128   ;;  %s604_s8 = smov 8  }
 0x23e   : > { %481 = dma.vmem_to_hbm [thread:$0]  (%p663_p5), %s699_s11, 512, %s697_s20, %s701_s16, %s603_s7, %s603_s7, %s604_s8  }
 0x23f PF: > { %p487_p1 = scmp.ge.s32.totalorder %s600_s15, 2  ;;  %s400_s9 = sand.u32 1, %s588_s12  }
 0x240   : > { %s401_s10 = scalar_lea.sflag [#allocation3], %s400_s9 }
 0x241   : > { %p484_p2 = pnand %p487_p1, %p667_p6 }
 0x243   : > { %583 = dma.done.wait (!%p484_p2), %s401_s10, 512  }
 0x244   : > { %585 = vsyncadd (!%p484_p2), %s401_s10, 4294966784  ;;  %p13_p3 = scmp.ge.s32.totalorder %s650_s18, 6   ;;  %s748_s12 = smov %s592_s13 }
 0x245   : > { %s749_s13 = smov %s596_s14  ;;  %s750_s14 = smov %s661_s21 }
 0x246   : > { %s751_s15 = smov %s650_s18  ;;  %15 = sbr.rel (!%p13_p3) target bundleno = 3 (0x3), region = 67 }
 0x24d   :  { %406 = vsyncpa [#allocation3], 1 }
 0x24e   :  { %408 = vsyncpa [#allocation3 + $0x1], 1 }

</bundles_post_ra>
